<compile_context>
chip_gen: v6e
topology: v6e:2x2x1
jax: 0.10.0
libtpu: 0.0.40
codegen_flags: <defaults>
</compile_context>

<pallas_src>
import functools

import jax
import jax.numpy as jnp
from jax import lax
from jax.experimental import pallas as pl
from jax.experimental.pallas import tpu as pltpu

EPS = 1e-5  # PyTorch LayerNorm default


def _layernorm_cols(h, gamma, beta):
    """h: (features, batch) -- normalize over the feature (sublane) axis."""
    mu = jnp.mean(h, axis=0, keepdims=True)
    c = h - mu
    var = jnp.mean(c * c, axis=0, keepdims=True)
    return c * lax.rsqrt(var + EPS) * gamma + beta


def _decoder_kernel(relu_slope, x_ref, w1_ref, ln1_ref, w2_ref, lnw3_ref, o_ref):
    x = x_ref[...]                                        # (tb, 64) f32 or bf16
    w1 = w1_ref[...].astype(x.dtype)                      # (32, 64)  (out, in)

    # h1^T = w1 . x^T : contract the shared 64-feature axis -> (32, tb)
    # (batch lands on the lane axis; f32 accumulation either way).
    h = lax.dot_general(w1, x, (((1,), (1,)), ((), ())),
                        preferred_element_type=jnp.float32)

    ln1 = ln1_ref[...]                                    # (32, 2) [gamma|beta]
    h = _layernorm_cols(h, ln1[:, 0:1], ln1[:, 1:2])
    h = jnp.maximum(h, relu_slope * h)                    # (Leaky)ReLU

    # (16, 32) @ (32, tb) -> (16, tb)
    h = jnp.dot(w2_ref[...], h, preferred_element_type=jnp.float32)

    p2 = lnw3_ref[...]                                    # (16, 4) [g2|b2|w3|b3]
    h = _layernorm_cols(h, p2[:, 0:1], p2[:, 1:2])
    h = jnp.maximum(h, relu_slope * h)

    # Final Linear(16 -> 1, bias): sublane reduce keeps the result lane-dense.
    w3 = p2[:, 2:3]                                       # (16, 1)
    b3 = p2[0:1, 3:4]                                     # (1, 1)
    y = jnp.sum(h * w3, axis=0, keepdims=True) + b3       # (1, tb)

    o_ref[...] = y[None].astype(o_ref.dtype)              # (1, 1, tb) block


def _round_up(x, m):
    return (x + m - 1) // m * m


def _cdiv(a, b):
    return (a + b - 1) // b


def vanilla_decoder(features, params, *, tile_b=8192, relu_slope=0.0, buffers=2):
    """features: (B, 64) float32 (or bfloat16 for the fast path). Returns (B, 1) f32."""
    B, d_in = features.shape
    assert d_in == 64
    w1t, ln1, w2t, lnw3 = params

    # Sublane alignment for the x block (8 rows for f32, 16 for bf16).
    row_mult = 8 * (4 // features.dtype.itemsize)

    # Equalized tiles: <= tile_b rows each, >= 2 tiles when B allows it (so the
    # "parallel" axis can span v7x's two TensorCores); ragged waste in the last
    # block stays < row_mult rows per tile and is simply sliced off (no pad).
    min_tiles = 2 if B >= 2 * row_mult else 1
    n_tiles = max(min_tiles, _cdiv(B, tile_b))
    tb = _round_up(_cdiv(B, n_tiles), row_mult)
    n_tiles = _cdiv(B, tb)

    # Widen the scoped-VMEM limit only when a large tile_b sweep needs it
    # (v5e default is 16 MiB); capped below v7x's 64 MiB physical VMEM.
    x_bytes = tb * 64 * features.dtype.itemsize
    need = max(2, buffers) * (x_bytes + tb * 4) + (4 << 20)
    vmem_limit = min(int(need), 64 << 20) if need > (16 << 20) else None

    x_spec = pl.BlockSpec((tb, 64), lambda i: (i, 0))
    if buffers != 2:  # optional deeper-pipelining sweep knob (review item 8)
        x_spec = pl.BlockSpec((tb, 64), lambda i: (i, 0),
                              pipeline_mode=pl.Buffered(buffers))

    def const_spec(shape):
        # Constant block index => parameter tile stays resident across steps.
        return pl.BlockSpec(shape, lambda i: (0, 0))

    out3d = pl.pallas_call(
        functools.partial(_decoder_kernel, float(relu_slope)),
        out_shape=jax.ShapeDtypeStruct((n_tiles, 1, tb), jnp.float32),
        grid_spec=pltpu.PrefetchScalarGridSpec(
            num_scalar_prefetch=0,
            grid=(n_tiles,),
            in_specs=[
                x_spec,                  # (tb, 64) batch tile
                const_spec((32, 64)),    # w1  (out, in)
                const_spec((32, 2)),     # [gamma1 | beta1]
                const_spec((16, 32)),    # w2  (out, in)
                const_spec((16, 4)),     # [gamma2 | beta2 | w3 | b3]
            ],
            out_specs=pl.BlockSpec((1, 1, tb), lambda i: (i, 0, 0)),
        ),
        compiler_params=pltpu.CompilerParams(
            dimension_semantics=("parallel",),
            vmem_limit_bytes=vmem_limit),
    )(features, w1t, ln1, w2t, lnw3)

    # (n_tiles, 1, tb) row-major == batch order; drop the ragged tail rows.
    return out3d.reshape(n_tiles * tb, 1)[:B]


def init_params(key):
    """Deterministic synthetic weights in the packed kernel layout."""
    k1, k2, k3, k4, k5, k6 = jax.random.split(key, 6)
    w1t = jax.random.normal(k1, (32, 64), jnp.float32) * (1.0 / 8.0)          # (out,in)
    g1 = 1.0 + 0.1 * jax.random.normal(k5, (32, 1), jnp.float32)
    b1 = 0.1 * jax.random.normal(k6, (32, 1), jnp.float32)
    ln1 = jnp.concatenate([g1, b1], axis=1)                                   # (32, 2)

    w2t = jax.random.normal(k2, (16, 32), jnp.float32) * (1.0 / jnp.sqrt(32.0))
    g2 = jnp.full((16, 1), 0.9, jnp.float32)
    b2 = jnp.full((16, 1), 0.05, jnp.float32)
    w3 = jax.random.normal(k3, (16, 1), jnp.float32) * 0.25                   # column
    b3 = jax.random.normal(k4, (1, 1), jnp.float32) * 0.1
    b3_col = jnp.zeros((16, 1), jnp.float32).at[0, 0].set(b3[0, 0])
    lnw3 = jnp.concatenate([g2, b2, w3, b3_col], axis=1)                      # (16, 4)
    return (w1t, ln1, w2t, lnw3)


def reference(features, params, relu_slope=0.0):
    """Pure-JAX reference matching the PyTorch forward (f32, highest precision)."""
    w1t, ln1, w2t, lnw3 = params
    g1, b1 = ln1[:, 0], ln1[:, 1]
    g2, b2, w3 = lnw3[:, 0], lnw3[:, 1], lnw3[:, 2]
    b3 = lnw3[0, 3]

    def ln(h, g, b):
        mu = jnp.mean(h, axis=-1, keepdims=True)
        c = h - mu
        var = jnp.mean(c * c, axis=-1, keepdims=True)
        return c * lax.rsqrt(var + EPS) * g + b

    def act(h):
        return jnp.maximum(h, relu_slope * h)

    hp = lax.Precision.HIGHEST
    x = features.astype(jnp.float32)
    h = act(ln(jnp.dot(x, w1t.T, precision=hp), g1, b1))
    h = act(ln(jnp.dot(h, w2t.T, precision=hp), g2, b2))
    return jnp.dot(h, w3[:, None], precision=hp) + b3


if __name__ == "__main__":
    key = jax.random.PRNGKey(0)
    kx, kp, kx2, kx3 = jax.random.split(key, 4)
    params = init_params(kp)

    # Tolerance covers the MXU's bf16-pass emulation modes for f32 matmuls.
    TOL = dict(atol=2e-2, rtol=2e-2)

    # 1) Small single-tile f32 check.
    B = 8
    feats = jax.random.normal(kx, (B, 64), jnp.float32)
    out = jax.block_until_ready(vanilla_decoder(feats, params))
    ref = reference(feats, params)
    assert out.shape == (B, 1)
    assert jnp.allclose(out, ref, **TOL), (out, ref)

    # 2) Ragged multi-tile f32 grid (exercises >=2 tiles + padless ragged tail).
    B2 = 200
    feats2 = jax.random.normal(kx2, (B2, 64), jnp.float32)
    out2 = jax.block_until_ready(vanilla_decoder(feats2, params, tile_b=64))
    ref2 = reference(feats2, params)
    assert out2.shape == (B2, 1)
    assert jnp.allclose(out2, ref2, **TOL)

    # 3) Opt-in bf16 input path (halves HBM read of x on v6e/v7x).
    B3 = 64
    feats3 = jax.random.normal(kx3, (B3, 64), jnp.float32)
    out3 = jax.block_until_ready(vanilla_decoder(feats3.astype(jnp.bfloat16), params))
    ref3 = reference(feats3.astype(jnp.bfloat16).astype(jnp.float32), params)
    assert out3.shape == (B3, 1)
    assert bool(jnp.all(jnp.isfinite(out3)))
    assert jnp.allclose(out3, ref3, atol=1e-1, rtol=1e-1)

    print("KERNEL_OK")
</pallas_src>

<mosaic_0001>
module attributes {stable_mosaic.version = 11 : i64} {
  func.func @_decoder_kernel(%arg0: i32, %arg1: memref<8x64xf32, #tpu.memory_space<vmem>>, %arg2: memref<32x64xf32, #tpu.memory_space<vmem>>, %arg3: memref<32x2xf32, #tpu.memory_space<vmem>>, %arg4: memref<16x32xf32, #tpu.memory_space<vmem>>, %arg5: memref<16x4xf32, #tpu.memory_space<vmem>>, %arg6: memref<1x1x8xf32, #tpu.memory_space<vmem>>) attributes {dimension_semantics = [#tpu.dimension_semantics<parallel>], iteration_bounds = array<i64: 1>, scalar_prefetch = 0 : i64, scratch_operands = 0 : i64, tpu.core_type = #tpu.core_type<tc>, window_params = [{transform_indices = @transform_0, window_bounds = array<i64: 8, 64>}, {pipeline_mode = #tpu.pipeline_mode<synchronous>, transform_indices = @transform_1, window_bounds = array<i64: 32, 64>}, {pipeline_mode = #tpu.pipeline_mode<synchronous>, transform_indices = @transform_2, window_bounds = array<i64: 32, 2>}, {pipeline_mode = #tpu.pipeline_mode<synchronous>, transform_indices = @transform_3, window_bounds = array<i64: 16, 32>}, {pipeline_mode = #tpu.pipeline_mode<synchronous>, transform_indices = @transform_4, window_bounds = array<i64: 16, 4>}, {transform_indices = @transform_5, window_bounds = array<i64: 1, 1, 8>}]} {
    %c0 = arith.constant 0 : index
    %c0_0 = arith.constant 0 : index
    %0 = vector.load %arg1[%c0, %c0_0] : memref<8x64xf32, #tpu.memory_space<vmem>>, vector<8x64xf32>
    %c0_1 = arith.constant 0 : index
    %c0_2 = arith.constant 0 : index
    %1 = vector.load %arg2[%c0_1, %c0_2] : memref<32x64xf32, #tpu.memory_space<vmem>>, vector<32x64xf32>
    %cst = arith.constant dense<0.000000e+00> : vector<32x8xf32>
    %2 = tpu.matmul %1, %0, %cst {dimension_numbers = #tpu.dot_dimension_numbers<[1], [1], [0], [0], [0, 0, 1, 0], [], []>} : vector<32x64xf32>, vector<8x64xf32>, vector<32x8xf32> -> vector<32x8xf32>
    %c0_3 = arith.constant 0 : index
    %c0_4 = arith.constant 0 : index
    %3 = vector.load %arg3[%c0_3, %c0_4] : memref<32x2xf32, #tpu.memory_space<vmem>>, vector<32x2xf32>
    %4 = vector.extract_strided_slice %3 {offsets = [0, 0], sizes = [32, 1], strides = [1, 1]} : vector<32x2xf32> to vector<32x1xf32>
    %5 = vector.extract_strided_slice %3 {offsets = [0, 1], sizes = [32, 1], strides = [1, 1]} : vector<32x2xf32> to vector<32x1xf32>
    %cst_5 = arith.constant dense<0.000000e+00> : vector<8xf32>
    %6 = vector.multi_reduction <add>, %2, %cst_5 [0] : vector<32x8xf32> to vector<8xf32>
    %7 = vector.shape_cast %6 : vector<8xf32> to vector<1x8xf32>
    %cst_6 = arith.constant 3.200000e+01 : f32
    %8 = vector.broadcast %cst_6 : f32 to vector<1x8xf32>
    %9 = arith.divf %7, %8 : vector<1x8xf32>
    %10 = vector.broadcast %9 : vector<1x8xf32> to vector<32x8xf32>
    %11 = arith.subf %2, %10 : vector<32x8xf32>
    %12 = arith.mulf %11, %11 : vector<32x8xf32>
    %cst_7 = arith.constant dense<0.000000e+00> : vector<8xf32>
    %13 = vector.multi_reduction <add>, %12, %cst_7 [0] : vector<32x8xf32> to vector<8xf32>
    %14 = vector.shape_cast %13 : vector<8xf32> to vector<1x8xf32>
    %cst_8 = arith.constant 3.200000e+01 : f32
    %15 = vector.broadcast %cst_8 : f32 to vector<1x8xf32>
    %16 = arith.divf %14, %15 : vector<1x8xf32>
    %cst_9 = arith.constant 9.99999974E-6 : f32
    %17 = vector.broadcast %cst_9 : f32 to vector<1x8xf32>
    %18 = arith.addf %16, %17 : vector<1x8xf32>
    %19 = math.rsqrt %18 : vector<1x8xf32>
    %20 = vector.broadcast %19 : vector<1x8xf32> to vector<32x8xf32>
    %21 = arith.mulf %11, %20 : vector<32x8xf32>
    %22 = vector.broadcast %4 : vector<32x1xf32> to vector<32x8xf32>
    %23 = arith.mulf %21, %22 : vector<32x8xf32>
    %24 = vector.broadcast %5 : vector<32x1xf32> to vector<32x8xf32>
    %25 = arith.addf %23, %24 : vector<32x8xf32>
    %cst_10 = arith.constant 0.000000e+00 : f32
    %26 = vector.broadcast %cst_10 : f32 to vector<32x8xf32>
    %27 = arith.mulf %26, %25 : vector<32x8xf32>
    %28 = arith.maximumf %25, %27 : vector<32x8xf32>
    %c0_11 = arith.constant 0 : index
    %c0_12 = arith.constant 0 : index
    %29 = vector.load %arg4[%c0_11, %c0_12] : memref<16x32xf32, #tpu.memory_space<vmem>>, vector<16x32xf32>
    %cst_13 = arith.constant dense<0.000000e+00> : vector<16x8xf32>
    %30 = tpu.matmul %29, %28, %cst_13 {dimension_numbers = #tpu.dot_dimension_numbers<[1], [0], [0], [1], [0, 0, 1, 1], [], []>} : vector<16x32xf32>, vector<32x8xf32>, vector<16x8xf32> -> vector<16x8xf32>
    %c0_14 = arith.constant 0 : index
    %c0_15 = arith.constant 0 : index
    %31 = vector.load %arg5[%c0_14, %c0_15] : memref<16x4xf32, #tpu.memory_space<vmem>>, vector<16x4xf32>
    %32 = vector.extract_strided_slice %31 {offsets = [0, 0], sizes = [16, 1], strides = [1, 1]} : vector<16x4xf32> to vector<16x1xf32>
    %33 = vector.extract_strided_slice %31 {offsets = [0, 1], sizes = [16, 1], strides = [1, 1]} : vector<16x4xf32> to vector<16x1xf32>
    %cst_16 = arith.constant dense<0.000000e+00> : vector<8xf32>
    %34 = vector.multi_reduction <add>, %30, %cst_16 [0] : vector<16x8xf32> to vector<8xf32>
    %35 = vector.shape_cast %34 : vector<8xf32> to vector<1x8xf32>
    %cst_17 = arith.constant 1.600000e+01 : f32
    %36 = vector.broadcast %cst_17 : f32 to vector<1x8xf32>
    %37 = arith.divf %35, %36 : vector<1x8xf32>
    %38 = vector.broadcast %37 : vector<1x8xf32> to vector<16x8xf32>
    %39 = arith.subf %30, %38 : vector<16x8xf32>
    %40 = arith.mulf %39, %39 : vector<16x8xf32>
    %cst_18 = arith.constant dense<0.000000e+00> : vector<8xf32>
    %41 = vector.multi_reduction <add>, %40, %cst_18 [0] : vector<16x8xf32> to vector<8xf32>
    %42 = vector.shape_cast %41 : vector<8xf32> to vector<1x8xf32>
    %cst_19 = arith.constant 1.600000e+01 : f32
    %43 = vector.broadcast %cst_19 : f32 to vector<1x8xf32>
    %44 = arith.divf %42, %43 : vector<1x8xf32>
    %cst_20 = arith.constant 9.99999974E-6 : f32
    %45 = vector.broadcast %cst_20 : f32 to vector<1x8xf32>
    %46 = arith.addf %44, %45 : vector<1x8xf32>
    %47 = math.rsqrt %46 : vector<1x8xf32>
    %48 = vector.broadcast %47 : vector<1x8xf32> to vector<16x8xf32>
    %49 = arith.mulf %39, %48 : vector<16x8xf32>
    %50 = vector.broadcast %32 : vector<16x1xf32> to vector<16x8xf32>
    %51 = arith.mulf %49, %50 : vector<16x8xf32>
    %52 = vector.broadcast %33 : vector<16x1xf32> to vector<16x8xf32>
    %53 = arith.addf %51, %52 : vector<16x8xf32>
    %cst_21 = arith.constant 0.000000e+00 : f32
    %54 = vector.broadcast %cst_21 : f32 to vector<16x8xf32>
    %55 = arith.mulf %54, %53 : vector<16x8xf32>
    %56 = arith.maximumf %53, %55 : vector<16x8xf32>
    %57 = vector.extract_strided_slice %31 {offsets = [0, 2], sizes = [16, 1], strides = [1, 1]} : vector<16x4xf32> to vector<16x1xf32>
    %58 = vector.extract_strided_slice %31 {offsets = [0, 3], sizes = [1, 1], strides = [1, 1]} : vector<16x4xf32> to vector<1x1xf32>
    %59 = vector.broadcast %57 : vector<16x1xf32> to vector<16x8xf32>
    %60 = arith.mulf %56, %59 : vector<16x8xf32>
    %cst_22 = arith.constant dense<0.000000e+00> : vector<8xf32>
    %61 = vector.multi_reduction <add>, %60, %cst_22 [0] : vector<16x8xf32> to vector<8xf32>
    %62 = vector.shape_cast %61 : vector<8xf32> to vector<1x8xf32>
    %63 = vector.broadcast %58 : vector<1x1xf32> to vector<1x8xf32>
    %64 = arith.addf %62, %63 : vector<1x8xf32>
    %65 = vector.shape_cast %64 : vector<1x8xf32> to vector<1x1x8xf32>
    %c0_23 = arith.constant 0 : index
    %c0_24 = arith.constant 0 : index
    %c0_25 = arith.constant 0 : index
    %66 = vector.load %arg6[%c0_23, %c0_24, %c0_25] : memref<1x1x8xf32, #tpu.memory_space<vmem>>, vector<1x1x8xf32>
    tpu.vector_store %arg6[%c0_23, %c0_24, %c0_25], %65 {strides = array<i32>} : memref<1x1x8xf32, #tpu.memory_space<vmem>>, vector<1x1x8xf32>,
    return
  }
  func.func @transform_0(%arg0: i32) -> (i32, i32) {
    %c0_i32 = arith.constant 0 : i32
    %c0_i32_0 = arith.constant 0 : i32
    return %arg0, %c0_i32 : i32, i32
  }
  func.func @transform_1(%arg0: i32) -> (i32, i32) {
    %c0_i32 = arith.constant 0 : i32
    %c0_i32_0 = arith.constant 0 : i32
    %c0_i32_1 = arith.constant 0 : i32
    return %c0_i32, %c0_i32_0 : i32, i32
  }
  func.func @transform_2(%arg0: i32) -> (i32, i32) {
    %c0_i32 = arith.constant 0 : i32
    %c0_i32_0 = arith.constant 0 : i32
    %c0_i32_1 = arith.constant 0 : i32
    return %c0_i32, %c0_i32_0 : i32, i32
  }
  func.func @transform_3(%arg0: i32) -> (i32, i32) {
    %c0_i32 = arith.constant 0 : i32
    %c0_i32_0 = arith.constant 0 : i32
    %c0_i32_1 = arith.constant 0 : i32
    return %c0_i32, %c0_i32_0 : i32, i32
  }
  func.func @transform_4(%arg0: i32) -> (i32, i32) {
    %c0_i32 = arith.constant 0 : i32
    %c0_i32_0 = arith.constant 0 : i32
    %c0_i32_1 = arith.constant 0 : i32
    return %c0_i32, %c0_i32_0 : i32, i32
  }
  func.func @transform_5(%arg0: i32) -> (i32, i32, i32) {
    %c0_i32 = arith.constant 0 : i32
    %c0_i32_0 = arith.constant 0 : i32
    %c0_i32_1 = arith.constant 0 : i32
    return %arg0, %c0_i32, %c0_i32_0 : i32, i32, i32
  }
}

</mosaic_0001>

<bundles_post_ra>
// kernel: tpu_custom_call.1
= control target key start
LH: loop header
LB: loop body
LE: loop exit
PB: predicated region body
PF: predicated region fallthrough
CT: control target
= control target key end

     0   :  { %10 = vsyncpa [#allocation3], 0  ;;  %s624_s0 = inlined_call_operand.hbm [shape: f32[8,64], index: 0, kind: input, shape index: {}]   ;;  %s625_s1 = inlined_call_operand.vmem [shape: f32[32,64], index: 1, kind: input, shape index: {}]   ;;  %s626_s2 = inlined_call_operand.vmem [shape: f32[32,2], index: 2, kind: input, shape index: {}]   ;;  %s627_s3 = inlined_call_operand.vmem [shape: f32[16,32], index: 3, kind: input, shape index: {}]   ;;  %s628_s4 = inlined_call_operand.vmem [shape: f32[16,4], index: 4, kind: input, shape index: {}]   ;;  %s629_s5 = inlined_call_operand.hbm [shape: f32[1,1,8], index: 5, kind: output, shape index: {}]  }
   0x1   :  { %11 = vsyncpa [#allocation4], 0  ;;  %s524_s18 = smov [#allocation2]  }
   0x2   :  { %s18_s19 = sshll.u32 %s524_s18, 4  ;;  %s19_s19 = int_to_ptr.vmem [resolvable:$true] %s18_s19 }
   0x3   :  { %s488_s20 = scalar_lea.vmem %s19_s19, 128  ;;  %p493_p1 = scmp.lt.s32.totalorder %s19_s19, %s19_s19 }
   0x4   :  { %p489_p0 = scmp.ne.s32.totalorder %s19_s19, %s488_s20  ;;  %p494_p2 = scmp.lt.s32.totalorder %s488_s20, %s488_s20 }
   0x6   :  { %p495_p3 = por %p494_p2, %p493_p1 }
   0x8   :  { %p496_p4 = pnand %p495_p3, %p489_p0 }
   0xa   :  { %499 = shalt.err (!%p496_p4)
}
   0xb   :  { %21 = dma.hbm_to_vmem [thread:$0]  %s624_s0, 128, %s19_s19, [#allocation3]  }
   0xc   :  { %520 = dma.done.wait [#allocation3], 128  }
   0xd   :  { %521 = vsyncadd [#allocation3], 4294967168  ;;  %v525_v0 = vmov 1   ;;  %v526_v1 = vmov 0   ;;  %vm38_vm0 = vcmask 523264   ;;  %v33_v2 = vld [vmem:[#allocation2] sm:$0xff] }
   0xe   :  { %465 = vset.pattern.permute.xlu1 %v525_v0  ;;  %464 = vset.pattern.permute.xlu0 %v526_v1  ;;  %v34_v3 = vld [vmem:[%s625_s1] sm:$0xff]  ;;  %v142_v4 = vld [vmem:[%s626_s2 + $0x18] sm:$0xff]  ;;  %v35_v5 = vld [vmem:[%s625_s1 + $0x8] sm:$0xff]  ;;  %vm241_vm1 = vcmask 261120   ;;  %v527_v14 = vmov 2   ;;  %v528_v15 = vmov 3  }
   0xf   :  { %439 = vmatprep.subr.msk.mxu0 %vm38_vm0, %v33_v2  ;;  %441 = vmatprep.mubr.msk.f32.mxu0 %vm38_vm0, %v34_v3  ;;  %v36_v6 = vld [vmem:[%s625_s1 + $0x10] sm:$0xff]  ;;  %v140_v8 = vld [vmem:[%s626_s2 + $0x8] sm:$0xff]  ;;  %v37_v9 = vld [vmem:[%s625_s1 + $0x18] sm:$0xff]  ;;  %vm143_vm2 = vcmask 64512   ;;  %vm404_vm3 = vcmask 57344  }
  0x10   :  { %440 = vmatpush3.xpose.msk.msra.mxu0 %vm38_vm0, %v33_v2  ;;  %224 = vperm.xlu1 %465, %v142_v4   ;;  %v141_v7 = vld [vmem:[%s626_s2 + $0x10] sm:$0xff]  ;;  %v139_v10 = vld [vmem:[%s626_s2] sm:$0xff]  ;;  %v324_v13 = vld [vmem:[%s628_s4 + $0x8] sm:$0xff] }
  0x11   :  { %204 = vperm.xlu0 %464, %v142_v4   ;;  %v239_v11 = vld [vmem:[%s627_s3] sm:$0xff] }
  0x12   :  { %455 = vmatprep.mubr.msk.f32.mxu1 %vm241_vm1, %v239_v11  ;;  %v323_v12 = vld [vmem:[%s628_s4] sm:$0xff] }
  0x13   :  { %442 = vmatmul.mubr.msk.f32.vlgmr.msra.gmra.mxu0 %vm38_vm0, %v35_v5 }
  0x14   :  { %444 = vmatprep.mubr.msk.f32.mxu0 %vm38_vm0, %v36_v6  ;;  %466 = vset.pattern.permute.xlu1 %v526_v1 }
  0x15   :  { %199 = vperm.xlu0 %464, %v141_v7   ;;  %194 = vperm.xlu1 %466, %v140_v8  }
  0x17   :  { %445 = vmatmul.mubr.msk.f32.gmra.mxu0 %vm38_vm0, %v37_v9 }
  0x19   :  { %467 = vset.pattern.permute.xlu0 %v525_v0  ;;  %189 = vperm.xlu1 %466, %v139_v10  }
  0x1a   :  { %220 = vperm.xlu0 %467, %v141_v7  }
  0x1d   :  { %468 = vset.pattern.permute.xlu1 %v525_v0 }
  0x1e   :  { %212 = vperm.xlu0 %467, %v139_v10   ;;  %216 = vperm.xlu1 %468, %v140_v8  }
  0x22   :  { %469 = vset.pattern.permute.xlu1 %v526_v1  ;;  %470 = vset.pattern.permute.xlu0 %v526_v1 }
  0x23   :  { %356 = vperm.xlu1 %469, %v323_v12   ;;  %361 = vperm.xlu0 %470, %v324_v13  }
  0x27   :  { %471 = vset.pattern.permute.xlu1 %v525_v0  ;;  %472 = vset.pattern.permute.xlu0 %v527_v14 }
  0x28   :  { %367 = vperm.xlu1 %471, %v323_v12   ;;  %381 = vperm.xlu0 %472, %v323_v12  }
  0x2c   :  { %371 = vperm.xlu1 %471, %v324_v13   ;;  %475 = vset.pattern.permute.xlu0 %v528_v15 }
  0x30   :  { %473 = vset.pattern.permute.xlu1 %v527_v14 }
  0x31   :  { %385 = vperm.xlu1 %473, %v324_v13  }
  0x35   :  { %474 = vset.pattern.permute.xlu1 %v528_v15 }
  0x36   :  { %400 = vperm.xlu1 %474, %v323_v12  }
  0x8b   :  { %v225_v56 = vpop.permute.xlu1 %224 }
  0x8c   :  { %v205_v58 = vpop.permute.xlu0 %204 }
  0x90   :  { %v195_v59 = vpop.permute.xlu1 %194  ;;  %v200_v60 = vpop.permute.xlu0 %199 }
  0x94   :  { %v190_v61 = vpop.permute.xlu1 %189 }
  0x95   :  { %v221_v62 = vpop.permute.xlu0 %220 }
  0x99   :  { %v217_v4 = vpop.permute.xlu1 %216  ;;  %v213_v9 = vpop.permute.xlu0 %212 }
  0xd3   :  { %v443_v16 = vpop.f32.mrf.mxu0 }
  0xd4   :  { %v145_v20 = vsel %vm143_vm2, %v443_v16, 0.0 }
  0xd5   :  { %v120_v17 = vpop.f32.mrf.mxu0 }
  0xd6   :  { %v144_v18 = vsel %vm143_vm2, %v120_v17, 0.0 }
  0xd7   :  { %v446_v19 = vpop.f32.mrf.mxu0  ;;  %v146_v21 = vadd.f32 %v145_v20, %v144_v18 }
  0xd8   :  { %v149_v25 = vsel %vm143_vm2, %v446_v19, 0.0 }
  0xd9   :  { %v130_v22 = vpop.f32.mrf.mxu0 }
  0xda   :  { %v147_v23 = vsel %vm143_vm2, %v130_v22, 0.0 }
  0xdb   :  { %v148_v24 = vadd.f32 %v147_v23, %v146_v21 }
  0xdd   :  { %v150_v26 = vadd.f32 %v149_v25, %v148_v24 }
  0xdf   :  { %v151_v27 = vrot.slane %v150_v26, 4 }
  0xe1   :  { %v152_v28 = vadd.f32 %v151_v27, %v150_v26 }
  0xe3   :  { %v153_v29 = vrot.slane %v152_v28, 2 }
  0xe5   :  { %v154_v30 = vadd.f32 %v153_v29, %v152_v28 }
  0xe7   :  { %v155_v31 = vrot.slane %v154_v30, 1 }
  0xe9   :  { %v156_v32 = vadd.f32 %v155_v31, %v154_v30 }
  0xeb   :  { %v158_v33 = vmul.f32 0.03125, %v156_v32 }
  0xed   :  { %v159_v34 = vsub.f32 %v120_v17, %v158_v33  ;;  %v160_v35 = vsub.f32 %v443_v16, %v158_v33  ;;  %v161_v36 = vsub.f32 %v130_v22, %v158_v33  ;;  %v162_v37 = vsub.f32 %v446_v19, %v158_v33  ;;  %v240_v22 = vld [vmem:[%s627_s3 + $0x8] sm:$0xff]  ;;  %s529_s3 = smov [#allocation5]  }
  0xee   :  { %s412_s18 = sshll.u32 %s529_s3, 4  ;;  %s413_s18 = int_to_ptr.vmem [resolvable:$true] %s412_s18 }
  0xef   :  { %v163_v38 = vmul.f32 %v159_v34, %v159_v34  ;;  %v164_v39 = vmul.f32 %v160_v35, %v160_v35  ;;  %v165_v40 = vmul.f32 %v161_v36, %v161_v36  ;;  %v166_v43 = vmul.f32 %v162_v37, %v162_v37  ;;  %s500_s19 = scalar_lea.vmem %s413_s18, 16  ;;  %s504_s20 = scalar_lea.vmem %s413_s18, 32 }
  0xf0   :  { %p501_p5 = scmp.ne.s32.totalorder %s413_s18, %s500_s19  ;;  %p505_p6 = scmp.lt.s32.totalorder %s413_s18, %s413_s18 }
  0xf1   :  { %v167_v41 = vsel %vm143_vm2, %v163_v38, 0.0  ;;  %v168_v42 = vsel %vm143_vm2, %v164_v39, 0.0  ;;  %v170_v45 = vsel %vm143_vm2, %v165_v40, 0.0  ;;  %v172_v47 = vsel %vm143_vm2, %v166_v43, 0.0  ;;  %p506_p7 = scmp.lt.s32.totalorder %s504_s20, %s500_s19 }
  0xf2   :  { %v169_v44 = vadd.f32 %v168_v42, %v167_v41 }
  0xf3   :  { %p507_p8 = por %p506_p7, %p505_p6 }
  0xf4   :  { %v171_v46 = vadd.f32 %v170_v45, %v169_v44 }
  0xf5   :  { %p508_p9 = pnand %p507_p8, %p501_p5 }
  0xf6   :  { %v173_v48 = vadd.f32 %v172_v47, %v171_v46 }
  0xf8   :  { %v174_v49 = vrot.slane %v173_v48, 4 }
  0xfa   :  { %v175_v50 = vadd.f32 %v174_v49, %v173_v48 }
  0xfc   :  { %v176_v51 = vrot.slane %v175_v50, 2 }
  0xfe   :  { %v177_v52 = vadd.f32 %v176_v51, %v175_v50  ;;  %v357_v50 = vpop.permute.xlu1 %356 }
 0x100   :  { %v178_v53 = vrot.slane %v177_v52, 1 }
 0x102   :  { %v179_v54 = vadd.f32 %v178_v53, %v177_v52  ;;  %v368_v51 = vpop.permute.xlu1 %367  ;;  %v362_v53 = vpop.permute.xlu0 %361 }
 0x104   :  { %v180_v55 = vmul.f32 0.03125, %v179_v54 }
 0x106   :  { %v181_v57 = vadd.f32 1e-05, %v180_v55 }
 0x108   :  { %476 = vrsqrt.f32 %v181_v57 }
 0x115   :  { %v477_v63 = vpop.eup %476 }
 0x116   :  { %v186_v0 = vmul.f32 %v477_v63, %v162_v37  ;;  %v184_v1 = vmul.f32 %v477_v63, %v160_v35  ;;  %v185_v2 = vmul.f32 %v477_v63, %v161_v36  ;;  %v183_v3 = vmul.f32 %v477_v63, %v159_v34  ;;  %v382_v63 = vpop.permute.xlu0 %381 }
 0x118   :  { %v210_v5 = vmul.f32 %v205_v58, %v186_v0  ;;  %v208_v6 = vmul.f32 %v195_v59, %v184_v1  ;;  %v209_v7 = vmul.f32 %v200_v60, %v185_v2  ;;  %v207_v8 = vmul.f32 %v190_v61, %v183_v3  ;;  %v372_v58 = vpop.permute.xlu1 %371 }
 0x11a   :  { %v230_v10 = vadd.f32 %v225_v56, %v210_v5  ;;  %v229_v11 = vadd.f32 %v221_v62, %v209_v7  ;;  %v228_v12 = vadd.f32 %v217_v4, %v208_v6  ;;  %v227_v14 = vadd.f32 %v213_v9, %v207_v8 }
 0x11c   :  { %v233_v13 = vmul.f32 0.0, %v229_v11  ;;  %v234_v15 = vmul.f32 0.0, %v230_v10  ;;  %v232_v16 = vmul.f32 0.0, %v228_v12  ;;  %v231_v19 = vmul.f32 0.0, %v227_v14  ;;  %v386_v0 = vpop.permute.xlu1 %385 }
 0x11e   :  { %v238_v17 = vmax.f32 %v230_v10, %v234_v15  ;;  %v237_v18 = vmax.f32 %v229_v11, %v233_v13  ;;  %v236_v20 = vmax.f32 %v228_v12, %v232_v16  ;;  %v235_v21 = vmax.f32 %v227_v14, %v231_v19 }
 0x120   :  { %447 = vmatprep.subr.mxu1 %v238_v17  ;;  %v401_v13 = vpop.permute.xlu1 %400 }
 0x121   :  { %448 = vmatpush3.msra.mxu1 %v238_v17 }
 0x122   :  { %449 = vmatprep.subr.mxu1 %v237_v18 }
 0x123   :  { %450 = vmatpush3.msra.mxu1 %v237_v18 }
 0x124   :  { %451 = vmatprep.subr.mxu1 %v236_v20 }
 0x125   :  { %452 = vmatpush3.msra.mxu1 %v236_v20 }
 0x126   :  { %453 = vmatprep.subr.mxu1 %v235_v21 }
 0x127   :  { %454 = vmatpush3.msra.mxu1 %v235_v21 }
 0x128   :  { %456 = vmatmul.mubr.msk.f32.vlgmr.msra.gmra.mxu1 %vm241_vm1, %v240_v22 }
 0x1e8   :  { %v457_v23 = vpop.f32.mrf.mxu1 }
 0x1e9   :  { %v326_v25 = vsel %vm143_vm2, %v457_v23, 0.0 }
 0x1ea   :  { %v314_v24 = vpop.f32.mrf.mxu1 }
 0x1eb   :  { %v325_v26 = vsel %vm143_vm2, %v314_v24, 0.0 }
 0x1ec   :  { %v327_v27 = vadd.f32 %v326_v25, %v325_v26 }
 0x1ee   :  { %v328_v28 = vrot.slane %v327_v27, 4 }
 0x1f0   :  { %v329_v29 = vadd.f32 %v328_v28, %v327_v27 }
 0x1f2   :  { %v330_v30 = vrot.slane %v329_v29, 2 }
 0x1f4   :  { %v331_v31 = vadd.f32 %v330_v30, %v329_v29 }
 0x1f6   :  { %v332_v32 = vrot.slane %v331_v31, 1 }
 0x1f8   :  { %v333_v33 = vadd.f32 %v332_v32, %v331_v31 }
 0x1fa   :  { %v335_v34 = vmul.f32 0.0625, %v333_v33 }
 0x1fc   :  { %v336_v35 = vsub.f32 %v314_v24, %v335_v34  ;;  %v337_v36 = vsub.f32 %v457_v23, %v335_v34 }
 0x1fe   :  { %v338_v37 = vmul.f32 %v336_v35, %v336_v35  ;;  %v339_v38 = vmul.f32 %v337_v36, %v337_v36 }
 0x200   :  { %v340_v39 = vsel %vm143_vm2, %v338_v37, 0.0  ;;  %v341_v40 = vsel %vm143_vm2, %v339_v38, 0.0 }
 0x201   :  { %v342_v41 = vadd.f32 %v341_v40, %v340_v39 }
 0x203   :  { %v343_v42 = vrot.slane %v342_v41, 4 }
 0x205   :  { %v344_v43 = vadd.f32 %v343_v42, %v342_v41 }
 0x207   :  { %v345_v44 = vrot.slane %v344_v43, 2 }
 0x209   :  { %v346_v45 = vadd.f32 %v345_v44, %v344_v43 }
 0x20b   :  { %v347_v46 = vrot.slane %v346_v45, 1 }
 0x20d   :  { %v348_v47 = vadd.f32 %v347_v46, %v346_v45 }
 0x20f   :  { %v349_v48 = vmul.f32 0.0625, %v348_v47 }
 0x211   :  { %v350_v49 = vadd.f32 1e-05, %v349_v48 }
 0x213   :  { %478 = vrsqrt.f32 %v350_v49 }
 0x220   :  { %v479_v52 = vpop.eup %478 }
 0x221   :  { %v352_v54 = vmul.f32 %v479_v52, %v336_v35  ;;  %v353_v55 = vmul.f32 %v479_v52, %v337_v36 }
 0x223   :  { %v364_v56 = vmul.f32 %v357_v50, %v352_v54  ;;  %v365_v57 = vmul.f32 %v362_v53, %v353_v55 }
 0x225   :  { %v374_v59 = vadd.f32 %v368_v51, %v364_v56  ;;  %v375_v60 = vadd.f32 %v372_v58, %v365_v57 }
 0x227   :  { %v376_v61 = vmul.f32 0.0, %v374_v59  ;;  %v377_v62 = vmul.f32 0.0, %v375_v60 }
 0x229   :  { %v378_v1 = vmax.f32 %v374_v59, %v376_v61  ;;  %v379_v2 = vmax.f32 %v375_v60, %v377_v62 }
 0x22b   :  { %v388_v3 = vmul.f32 %v382_v63, %v378_v1  ;;  %v389_v4 = vmul.f32 %v386_v0, %v379_v2 }
 0x22d   :  { %v390_v5 = vsel %vm143_vm2, %v388_v3, 0.0  ;;  %v391_v6 = vsel %vm143_vm2, %v389_v4, 0.0 }
 0x22e   :  { %v392_v7 = vadd.f32 %v391_v6, %v390_v5 }
 0x230   :  { %v393_v8 = vrot.slane %v392_v7, 4 }
 0x232   :  { %v394_v9 = vadd.f32 %v393_v8, %v392_v7 }
 0x234   :  { %v395_v10 = vrot.slane %v394_v9, 2 }
 0x236   :  { %v396_v11 = vadd.f32 %v395_v10, %v394_v9 }
 0x238   :  { %v397_v12 = vrot.slane %v396_v11, 1 }
 0x23a   :  { %v398_v14 = vadd.f32 %v397_v12, %v396_v11 }
 0x23c   :  { %v403_v15 = vadd.f32 %v401_v13, %v398_v14 }
 0x23e   :  { %405 = vst.msk [vmem:[#allocation5] sm:$0x1] %vm404_vm3, %v403_v15 }
 0x23f   :  { %511 = shalt.err (!%p508_p9)
}
 0x240   :  { %415 = dma.vmem_to_hbm [thread:$0]  %s413_s18, 16, %s629_s5, [#allocation4]  }
 0x241   :  { %522 = dma.done.wait [#allocation4], 16  }
 0x242   :  { %523 = vsyncadd [#allocation4], 4294967280 }
 0x243   :  { %419 = vsyncpa [#allocation3], 1 }
 0x244   :  { %420 = vsyncpa [#allocation4], 1 }

</bundles_post_ra>
